<compile_context>
chip_gen: v7x
topology: tpu7x:2x2x1
jax: 0.10.0
libtpu: 0.0.40
codegen_flags: <defaults>
</compile_context>

<pallas_src>
import functools

import jax
import jax.numpy as jnp
from jax.experimental import pallas as pl
from jax.experimental.pallas import tpu as pltpu


def _round_up(x, m):
    return (x + m - 1) // m * m


def _vmem_capacity_bytes():
    """Physical VMEM per TensorCore; conservative fallback if the query fails."""
    try:
        info = pltpu.get_tpu_info()
        cap = int(getattr(info, "vmem_capacity_bytes", 0))
        if cap > 0:
            return cap
    except Exception:
        pass
    return 64 << 20  # v7x per-TC capacity (smallest recent generation)


def _footprint_bytes(tm, ti, H, x_isz, w_isz):
    """VMEM for one grid step: double-buffered tiles + accumulator + intermediates."""
    buffers = 2 * (tm * H * x_isz          # x tile
                   + H * 2 * ti * w_isz    # fused [gate|up] weight tile
                   + ti * H * w_isz        # down-proj weight tile
                   + tm * H * x_isz)       # output tile
    acc = tm * H * 4                       # resident f32 accumulator
    # In-kernel intermediates: gu (f32), sigmoid (f32), hidden (weight dtype).
    interm = tm * 2 * ti * 4 + tm * ti * 4 + tm * ti * w_isz
    return buffers + acc + interm


def prepare_llama_mlp_weights(gate_w, up_w, down_w, *, ti=512, dtype=jnp.bfloat16):
    """One-time (model-load) weight preparation. NOT per forward pass.

    gate_w / up_w: (I, H)  -- PyTorch nn.Linear [out, in] layout.
    down_w:        (H, I)
    Returns (wgu, w_down, ti) where
      wgu:    (H, 2*I_pad) per-I-tile interleaved [gate_j | up_j], dtype `dtype`
      w_down: (I_pad, H)
      ti:     effective I tile (multiple of 128, divides I_pad)
    """
    assert ti % 128 == 0, "ti must be a multiple of 128 (lane width)"
    I, H = gate_w.shape
    assert H % 128 == 0, "hidden size must be lane-aligned"

    w_gate = jnp.asarray(gate_w).T.astype(dtype)   # (H, I)
    w_up = jnp.asarray(up_w).T.astype(dtype)       # (H, I)
    w_down = jnp.asarray(down_w).T.astype(dtype)   # (I, H)

    ti_eff = min(ti, _round_up(I, 128))
    I_pad = _round_up(I, ti_eff)
    if I_pad != I:
        # Zero-padded gate/up columns give hidden == 0 and the padded down-proj
        # rows are zero, so padding does not change the result.
        w_gate = jnp.pad(w_gate, ((0, 0), (0, I_pad - I)))
        w_up = jnp.pad(w_up, ((0, 0), (0, I_pad - I)))
        w_down = jnp.pad(w_down, ((0, I_pad - I), (0, 0)))

    n_i = I_pad // ti_eff
    wgu = jnp.concatenate(
        [w_gate.reshape(H, n_i, ti_eff), w_up.reshape(H, n_i, ti_eff)],
        axis=-1).reshape(H, 2 * I_pad)
    return wgu, w_down, ti_eff


def llama_mlp_kernel(x_ref, wgu_ref, wd_ref, o_ref, acc_ref, *, ti):
    # x_ref:   (TM, H)       token tile
    # wgu_ref: (H, 2*ti)     fused [gate_tile | up_tile] weights (in, out)
    # wd_ref:  (ti, H)       down_proj weight tile (in, out)
    # o_ref:   (TM, H)
    # acc_ref: (TM, H) f32   down-projection accumulator (resident over I axis)
    j = pl.program_id(1)

    @pl.when(j == 0)
    def _():
        acc_ref[...] = jnp.zeros_like(acc_ref)

    x = x_ref[...]

    # One wide matmul for gate+up, f32 accumulation on the MXU.
    gu = jnp.dot(x, wgu_ref[...], preferred_element_type=jnp.float32)  # (TM, 2*ti)
    gate = gu[:, :ti]
    up = gu[:, ti:].astype(wd_ref.dtype)   # narrow early: less VALU/VMEM traffic

    # SiLU(gate) = gate * sigmoid(gate); exp and approx reciprocal both on EUP.
    sig = pl.reciprocal(1.0 + jnp.exp(-gate), approx=True)
    hidden = (gate * sig).astype(wd_ref.dtype) * up

    acc_ref[...] += jnp.dot(hidden, wd_ref[...], preferred_element_type=jnp.float32)

    @pl.when(j == pl.num_programs(1) - 1)
    def _():
        o_ref[...] = acc_ref[...].astype(o_ref.dtype)


def llama_mlp(x, wgu, w_down, *, ti, tm=None):
    """x: (T, H). wgu/w_down: outputs of prepare_llama_mlp_weights (same ti)."""
    T, H = x.shape
    I_pad = w_down.shape[0]
    assert w_down.shape == (I_pad, H)
    assert wgu.shape == (H, 2 * I_pad)
    assert H % 128 == 0
    assert ti % 128 == 0 and I_pad % ti == 0
    n_i = I_pad // ti

    x_isz = jnp.dtype(x.dtype).itemsize
    w_isz = jnp.dtype(wgu.dtype).itemsize
    vmem_cap = _vmem_capacity_bytes()
    budget = vmem_cap - (8 << 20)          # headroom for compiler scratch

    if tm is None:
        # Largest token tile (multiple of 16 for bf16 sublane packing) that
        # fits the VMEM budget and doesn't exceed the token count.
        t_cap = max(16, _round_up(T, 16))
        tm = 16
        for cand in (1024, 512, 256, 128, 64, 32, 16):
            if cand <= t_cap and _footprint_bytes(cand, ti, H, x_isz, w_isz) <= budget:
                tm = cand
                break
    tm = max(16, _round_up(min(tm, _round_up(T, 16)), 16))

    # Pad tokens to a tile multiple (padded rows are zero and discarded).
    T_pad = _round_up(T, tm)
    if T_pad != T:
        x = jnp.pad(x, ((0, T_pad - T), (0, 0)))

    footprint = _footprint_bytes(tm, ti, H, x_isz, w_isz)
    vmem_limit = int(min(max(footprint + (4 << 20), 16 << 20), vmem_cap - (1 << 20)))

    flops = 2 * T_pad * H * (2 * I_pad) + 2 * T_pad * I_pad * H
    bytes_accessed = (T_pad * H * x_isz + wgu.size * w_isz
                      + w_down.size * w_isz + T_pad * H * x_isz)
    cost = pl.CostEstimate(flops=flops,
                           transcendentals=T_pad * I_pad,
                           bytes_accessed=bytes_accessed)

    out = pl.pallas_call(
        functools.partial(llama_mlp_kernel, ti=ti),
        out_shape=jax.ShapeDtypeStruct((T_pad, H), x.dtype),
        grid_spec=pltpu.PrefetchScalarGridSpec(
            num_scalar_prefetch=0,
            grid=(T_pad // tm, n_i),
            in_specs=[
                pl.BlockSpec((tm, H), lambda i, j: (i, 0)),        # x tile
                pl.BlockSpec((H, 2 * ti), lambda i, j: (0, j)),    # [gate|up] tile
                pl.BlockSpec((ti, H), lambda i, j: (j, 0)),        # down tile
            ],
            out_specs=pl.BlockSpec((tm, H), lambda i, j: (i, 0)),
            scratch_shapes=[pltpu.VMEM((tm, H), jnp.float32)],
        ),
        compiler_params=pltpu.CompilerParams(
            dimension_semantics=("parallel", "arbitrary"),
            vmem_limit_bytes=vmem_limit,
        ),
        cost_estimate=cost,
    )(x, wgu, w_down)

    return out[:T]


if __name__ == "__main__":
    # Small config consistent with LlamaMLP(config)
    batch, seq = 2, 8
    hidden_size = 128
    intermediate_size = 256

    key = jax.random.PRNGKey(0)
    kx, kg, ku, kd = jax.random.split(key, 4)

    x = jax.random.normal(kx, (batch, seq, hidden_size), dtype=jnp.float32)

    # Deterministic "nn.Linear(bias=False)" weights in PyTorch layout (out, in).
    scale_h = 1.0 / (hidden_size ** 0.5)
    scale_i = 1.0 / (intermediate_size ** 0.5)
    gate_w_pt = jax.random.uniform(kg, (intermediate_size, hidden_size),
                                   minval=-scale_h, maxval=scale_h)
    up_w_pt = jax.random.uniform(ku, (intermediate_size, hidden_size),
                                 minval=-scale_h, maxval=scale_h)
    down_w_pt = jax.random.uniform(kd, (hidden_size, intermediate_size),
                                   minval=-scale_i, maxval=scale_i)

    # One-time weight preparation (model-load time), NOT per forward pass.
    wgu, w_down, ti = prepare_llama_mlp_weights(gate_w_pt, up_w_pt, down_w_pt,
                                                ti=512, dtype=jnp.bfloat16)

    x2d = x.reshape(batch * seq, hidden_size).astype(jnp.bfloat16)

    out = llama_mlp(x2d, wgu, w_down, ti=ti)
    out = jax.block_until_ready(out).astype(jnp.float32)
    out = out.reshape(batch, seq, hidden_size)

    # Reference mirroring the kernel's precision choices:
    # bf16 inputs/weights, f32 accumulation, bf16 hidden before the down matmul.
    w_gate_f = gate_w_pt.T.astype(jnp.bfloat16).astype(jnp.float32)
    w_up_f = up_w_pt.T.astype(jnp.bfloat16).astype(jnp.float32)
    w_down_f = down_w_pt.T.astype(jnp.bfloat16).astype(jnp.float32)
    xf = x2d.astype(jnp.float32)
    g = xf @ w_gate_f
    u = xf @ w_up_f
    h = (jax.nn.silu(g) * u).astype(jnp.bfloat16).astype(jnp.float32)
    ref = (h @ w_down_f).reshape(batch, seq, hidden_size)

    err = float(jnp.max(jnp.abs(out - ref)))
    assert err < 2e-2, f"mismatch vs reference: max abs err {err}"

    print("KERNEL_OK")
</pallas_src>

<mosaic_0001>
module attributes {stable_mosaic.version = 11 : i64} {
  func.func @llama_mlp_kernel(%arg0: i32, %arg1: i32, %arg2: memref<16x128xbf16, #tpu.memory_space<vmem>>, %arg3: memref<128x512xbf16, #tpu.memory_space<vmem>>, %arg4: memref<256x128xbf16, #tpu.memory_space<vmem>>, %arg5: memref<16x128xbf16, #tpu.memory_space<vmem>>, %arg6: memref<16x128xf32, #tpu.memory_space<vmem>>) attributes {dimension_semantics = [#tpu.dimension_semantics<parallel>, #tpu.dimension_semantics<arbitrary>], iteration_bounds = array<i64: 1, 1>, scalar_prefetch = 0 : i64, scratch_operands = 1 : i64, tpu.core_type = #tpu.core_type<tc>, window_params = [{transform_indices = @transform_0, window_bounds = array<i64: 16, 128>}, {transform_indices = @transform_1, window_bounds = array<i64: 128, 512>}, {transform_indices = @transform_2, window_bounds = array<i64: 256, 128>}, {transform_indices = @transform_3, window_bounds = array<i64: 16, 128>}]} {
    %c0_i32 = arith.constant 0 : i32
    %0 = arith.cmpi eq, %arg1, %c0_i32 : i32
    %1 = arith.extui %0 : i1 to i32
    %c0_i32_0 = arith.constant 0 : i32
    %2 = arith.cmpi ne, %1, %c0_i32_0 : i32
    scf.if %2 {
      %cst_15 = arith.constant 0.000000e+00 : f32
      %26 = vector.broadcast %cst_15 : f32 to vector<16x128xf32>
      %c0_16 = arith.constant 0 : index
      %c0_17 = arith.constant 0 : index
      %27 = vector.load %arg6[%c0_16, %c0_17] : memref<16x128xf32, #tpu.memory_space<vmem>>, vector<16x128xf32>
      tpu.vector_store %arg6[%c0_16, %c0_17], %26 {strides = array<i32>} : memref<16x128xf32, #tpu.memory_space<vmem>>, vector<16x128xf32>,
    } else {
    }
    %c0 = arith.constant 0 : index
    %c0_1 = arith.constant 0 : index
    %3 = vector.load %arg2[%c0, %c0_1] : memref<16x128xbf16, #tpu.memory_space<vmem>>, vector<16x128xbf16>
    %c0_2 = arith.constant 0 : index
    %c0_3 = arith.constant 0 : index
    %4 = vector.load %arg3[%c0_2, %c0_3] : memref<128x512xbf16, #tpu.memory_space<vmem>>, vector<128x512xbf16>
    %cst = arith.constant dense<0.000000e+00> : vector<16x512xf32>
    %5 = tpu.matmul %3, %4, %cst {dimension_numbers = #tpu.dot_dimension_numbers<[1], [0], [0], [1], [0, 0, 1, 1], [], []>} : vector<16x128xbf16>, vector<128x512xbf16>, vector<16x512xf32> -> vector<16x512xf32>
    %6 = vector.extract_strided_slice %5 {offsets = [0, 0], sizes = [16, 256], strides = [1, 1]} : vector<16x512xf32> to vector<16x256xf32>
    %7 = vector.extract_strided_slice %5 {offsets = [0, 256], sizes = [16, 256], strides = [1, 1]} : vector<16x512xf32> to vector<16x256xf32>
    %8 = arith.truncf %7 : vector<16x256xf32> to vector<16x256xbf16>
    %cst_4 = arith.constant 0.000000e+00 : f32
    %9 = vector.broadcast %cst_4 : f32 to vector<16x256xf32>
    %10 = arith.subf %9, %6 : vector<16x256xf32>
    %11 = math.exp %10 : vector<16x256xf32>
    %cst_5 = arith.constant 1.000000e+00 : f32
    %12 = vector.broadcast %cst_5 : f32 to vector<16x256xf32>
    %13 = arith.addf %12, %11 : vector<16x256xf32>
    %14 = tpu.reciprocal %13 {approx = true} : vector<16x256xf32> -> vector<16x256xf32>
    %15 = arith.mulf %6, %14 : vector<16x256xf32>
    %16 = arith.truncf %15 : vector<16x256xf32> to vector<16x256xbf16>
    %17 = arith.mulf %16, %8 : vector<16x256xbf16>
    %c0_6 = arith.constant 0 : index
    %c0_7 = arith.constant 0 : index
    %18 = vector.load %arg6[%c0_6, %c0_7] : memref<16x128xf32, #tpu.memory_space<vmem>>, vector<16x128xf32>
    %c0_8 = arith.constant 0 : index
    %c0_9 = arith.constant 0 : index
    %19 = vector.load %arg4[%c0_8, %c0_9] : memref<256x128xbf16, #tpu.memory_space<vmem>>, vector<256x128xbf16>
    %cst_10 = arith.constant dense<0.000000e+00> : vector<16x128xf32>
    %20 = tpu.matmul %17, %19, %cst_10 {dimension_numbers = #tpu.dot_dimension_numbers<[1], [0], [0], [1], [0, 0, 1, 1], [], []>} : vector<16x256xbf16>, vector<256x128xbf16>, vector<16x128xf32> -> vector<16x128xf32>
    %21 = arith.addf %18, %20 : vector<16x128xf32>
    %c0_11 = arith.constant 0 : index
    %c0_12 = arith.constant 0 : index
    %22 = vector.load %arg6[%c0_11, %c0_12] : memref<16x128xf32, #tpu.memory_space<vmem>>, vector<16x128xf32>
    tpu.vector_store %arg6[%c0_11, %c0_12], %21 {strides = array<i32>} : memref<16x128xf32, #tpu.memory_space<vmem>>, vector<16x128xf32>,
    %c0_i32_13 = arith.constant 0 : i32
    %23 = arith.cmpi eq, %arg1, %c0_i32_13 : i32
    %24 = arith.extui %23 : i1 to i32
    %c0_i32_14 = arith.constant 0 : i32
    %25 = arith.cmpi ne, %24, %c0_i32_14 : i32
    scf.if %25 {
      %c0_15 = arith.constant 0 : index
      %c0_16 = arith.constant 0 : index
      %26 = vector.load %arg6[%c0_15, %c0_16] : memref<16x128xf32, #tpu.memory_space<vmem>>, vector<16x128xf32>
      %27 = arith.truncf %26 : vector<16x128xf32> to vector<16x128xbf16>
      %c0_17 = arith.constant 0 : index
      %c0_18 = arith.constant 0 : index
      %28 = vector.load %arg5[%c0_17, %c0_18] : memref<16x128xbf16, #tpu.memory_space<vmem>>, vector<16x128xbf16>
      tpu.vector_store %arg5[%c0_17, %c0_18], %27 {strides = array<i32>} : memref<16x128xbf16, #tpu.memory_space<vmem>>, vector<16x128xbf16>,
    } else {
    }
    return
  }
  func.func @transform_0(%arg0: i32, %arg1: i32) -> (i32, i32) {
    %c0_i32 = arith.constant 0 : i32
    %c0_i32_0 = arith.constant 0 : i32
    return %arg0, %c0_i32 : i32, i32
  }
  func.func @transform_1(%arg0: i32, %arg1: i32) -> (i32, i32) {
    %c0_i32 = arith.constant 0 : i32
    %c0_i32_0 = arith.constant 0 : i32
    return %c0_i32, %arg1 : i32, i32
  }
  func.func @transform_2(%arg0: i32, %arg1: i32) -> (i32, i32) {
    %c0_i32 = arith.constant 0 : i32
    %c0_i32_0 = arith.constant 0 : i32
    return %arg1, %c0_i32 : i32, i32
  }
  func.func @transform_3(%arg0: i32, %arg1: i32) -> (i32, i32) {
    %c0_i32 = arith.constant 0 : i32
    %c0_i32_0 = arith.constant 0 : i32
    return %arg0, %c0_i32 : i32, i32
  }
}

</mosaic_0001>

<bundles_post_ra>
// kernel: tpu_custom_call.1
= control target key start
LH: loop header
LB: loop body
LE: loop exit
PB: predicated region body
PF: predicated region fallthrough
CT: control target
= control target key end

     0   :  { %8 = vsyncpa [#allocation4], 0  ;;  %s937_s0 = inlined_call_operand.hbm [shape: bf16[16,128], index: 0, kind: input, shape index: {}]   ;;  %s938_s1 = inlined_call_operand.hbm [shape: bf16[128,512], index: 1, kind: input, shape index: {}]   ;;  %s939_s2 = inlined_call_operand.hbm [shape: bf16[256,128], index: 2, kind: input, shape index: {}]   ;;  %s940_s3 = inlined_call_operand.hbm [shape: bf16[16,128], index: 3, kind: output, shape index: {}]  }
   0x1   :  { %9 = vsyncpa [#allocation7], 0 }
   0x2   :  { %10 = vsyncpa [#allocation5], 0  ;;  %s851_s12 = smov [#allocation6]   ;;  %s757_s16 = scalar_lea.hbm %s938_s1, 4096 }
   0x3   :  { %s28_s13 = sshll.u32 %s851_s12, 4  ;;  %p758_p0 = scmp.ne.s32.totalorder %s938_s1, %s757_s16  ;;  %s29_s13 = int_to_ptr.vmem [resolvable:$true] %s28_s13 }
   0x4   :  { %p761_p1 = scmp.lt.u32.totalorder %s757_s16, %s938_s1 }
   0x6   :  { %p763_p2 = pnand %p761_p1, %p758_p0 }
   0x8   :  { %766 = shalt.err (!%p763_p2)
}
   0x9   :  { %s767_s21 = scalar_lea.vmem %s29_s13, 4096  ;;  %p772_p4 = scmp.lt.s32.totalorder %s29_s13, %s29_s13 }
   0xa   :  { %p768_p3 = scmp.ne.s32.totalorder %s29_s13, %s767_s21  ;;  %p773_p5 = scmp.lt.s32.totalorder %s767_s21, %s767_s21 }
   0xc   :  { %p774_p6 = por %p773_p5, %p772_p4 }
   0xe   :  { %p775_p7 = pnand %p774_p6, %p768_p3 }
  0x10   :  { %778 = shalt.err (!%p775_p7)
}
  0x11   :  { %s852_s22 = smov 256   ;;  %s853_s23 = smov 16  }
  0x12   :  { %34 = dma.hbm_to_vmem [thread:$0]  %s938_s1, 4096, %s29_s13, [#allocation7], %s852_s22, %s852_s22, %s853_s23  }
  0x13   :  { %s854_s26 = smov [#allocation3]   ;;  %s779_s30 = scalar_lea.hbm %s937_s0, 128 }
  0x14   :  { %s16_s27 = sshll.u32 %s854_s26, 4  ;;  %p780_p8 = scmp.ne.s32.totalorder %s937_s0, %s779_s30  ;;  %s17_s27 = int_to_ptr.vmem [resolvable:$true] %s16_s27 }
  0x15   :  { %p783_p9 = scmp.lt.u32.totalorder %s779_s30, %s937_s0 }
  0x17   :  { %p785_p10 = pnand %p783_p9, %p780_p8 }
  0x19   :  { %788 = shalt.err (!%p785_p10)
}
  0x1a   :  { %s789_s8 = scalar_lea.vmem %s17_s27, 128  ;;  %p794_p12 = scmp.lt.s32.totalorder %s17_s27, %s17_s27 }
  0x1b   :  { %p790_p11 = scmp.ne.s32.totalorder %s17_s27, %s789_s8  ;;  %p795_p13 = scmp.lt.s32.totalorder %s789_s8, %s789_s8 }
  0x1d   :  { %p796_p0 = por %p795_p13, %p794_p12 }
  0x1f   :  { %p797_p1 = pnand %p796_p0, %p790_p11 }
  0x21   :  { %800 = shalt.err (!%p797_p1)
}
  0x22   :  { %s855_s1 = smov 64   ;;  %s856_s9 = smov 4  }
  0x23   :  { %22 = dma.hbm_to_vmem [thread:$0]  %s937_s0, 128, %s17_s27, [#allocation4], %s855_s1, %s855_s1, %s856_s9  }
  0x24   :  { %s857_s12 = smov [#allocation8]   ;;  %s801_s16 = scalar_lea.hbm %s939_s2, 2048 }
  0x25   :  { %s40_s13 = sshll.u32 %s857_s12, 4  ;;  %p802_p2 = scmp.ne.s32.totalorder %s939_s2, %s801_s16  ;;  %s41_s13 = int_to_ptr.vmem [resolvable:$true] %s40_s13 }
  0x26   :  { %p805_p3 = scmp.lt.u32.totalorder %s801_s16, %s939_s2 }
  0x28   :  { %p807_p4 = pnand %p805_p3, %p802_p2 }
  0x2a   :  { %810 = shalt.err (!%p807_p4)
}
  0x2b   :  { %s811_s21 = scalar_lea.vmem %s41_s13, 2048  ;;  %p816_p6 = scmp.lt.s32.totalorder %s41_s13, %s41_s13 }
  0x2c   :  { %p812_p5 = scmp.ne.s32.totalorder %s41_s13, %s811_s21  ;;  %p817_p7 = scmp.lt.s32.totalorder %s811_s21, %s811_s21 }
  0x2e   :  { %p818_p8 = por %p817_p7, %p816_p6 }
  0x30   :  { %p819_p9 = pnand %p818_p8, %p812_p5 }
  0x32   :  { %822 = shalt.err (!%p819_p9)
}
  0x33   :  { %46 = dma.hbm_to_vmem [thread:$0]  %s939_s2, 2048, %s41_s13, [#allocation7], %s855_s1, %s855_s1, %s856_s9  }
  0x34   :  { %845 = dma.done.wait [#allocation4], 128  }
  0x35   :  { %846 = vsyncadd [#allocation4], 4294967168 }
  0x36   :  { %847 = dma.done.wait [#allocation7], 6144  }
  0x37   :  { %848 = vsyncadd [#allocation7], 4294961152  ;;  %v858_v0 = vmov 0   ;;  %v676_v1 = vld [vmem:[#allocation6 + $0x4] ss:$16 sps:$4 sm:$0xff]   ;;  %v705_v29 = vld [vmem:[#allocation3] sm:$0xff]  }
  0x38   :  { %295 = vmatprep.mubr.bf16.mxu0 %v858_v0  ;;  %338 = vmatprep.mubr.bf16.mxu1 %v858_v0  ;;  %v678_v2 = vld [vmem:[#allocation6] ss:$16 sps:$4 sm:$0xff]   ;;  %v679_v3 = vld [vmem:[#allocation6 + $0x24] ss:$16 sps:$4 sm:$0xff]   ;;  %v697_v8 = vld [vmem:[#allocation6 + $0xc] ss:$16 sps:$4 sm:$0xff]  }
  0x39   :  { %263 = vmatprep.subr.bf16.mxu0 %v676_v1  ;;  %v681_v4 = vld [vmem:[#allocation6 + $0x20] ss:$16 sps:$4 sm:$0xff]   ;;  %v682_v5 = vld [vmem:[#allocation6 + $0x44] ss:$16 sps:$4 sm:$0xff]   ;;  %v701_v11 = vld [vmem:[#allocation6 + $0x8] ss:$16 sps:$4 sm:$0xff]   ;;  %306 = vmatprep.subr.bf16.mxu1 %v697_v8 }
  0x3a   :  { %264 = vmatpush1.bf16.msra.mxu0 %v678_v2  ;;  %v684_v6 = vld [vmem:[#allocation6 + $0x40] ss:$16 sps:$4 sm:$0xff]   ;;  %v685_v7 = vld [vmem:[#allocation6 + $0x64] ss:$16 sps:$4 sm:$0xff]   ;;  %v703_v12 = vld [vmem:[#allocation6 + $0x2c] ss:$16 sps:$4 sm:$0xff]   ;;  %307 = vmatpush1.bf16.msra.mxu1 %v701_v11 }
  0x3b   :  { %265 = vmatprep.subr.bf16.mxu0 %v679_v3  ;;  %v687_v9 = vld [vmem:[#allocation6 + $0x60] ss:$16 sps:$4 sm:$0xff]   ;;  %v688_v10 = vld [vmem:[#allocation6 + $0x84] ss:$16 sps:$4 sm:$0xff]   ;;  %308 = vmatprep.subr.bf16.mxu1 %v703_v12  ;;  %v706_v13 = vld [vmem:[#allocation6 + $0x28] ss:$16 sps:$4 sm:$0xff]  }
  0x3c   :  { %v690_v14 = vld [vmem:[#allocation6 + $0x80] ss:$16 sps:$4 sm:$0xff]   ;;  %v707_v15 = vld [vmem:[#allocation6 + $0x4c] ss:$16 sps:$4 sm:$0xff]   ;;  %v691_v16 = vld [vmem:[#allocation6 + $0xa4] ss:$16 sps:$4 sm:$0xff]  }
  0x3d   :  { %v709_v17 = vld [vmem:[#allocation6 + $0x48] ss:$16 sps:$4 sm:$0xff]   ;;  %v710_v18 = vld [vmem:[#allocation6 + $0x6c] ss:$16 sps:$4 sm:$0xff]   ;;  %v693_v19 = vld [vmem:[#allocation6 + $0xa0] ss:$16 sps:$4 sm:$0xff]  }
  0x3e   :  { %266 = vmatpush1.bf16.msra.mxu0 %v681_v4  ;;  %309 = vmatpush1.bf16.msra.mxu1 %v706_v13  ;;  %v694_v20 = vld [vmem:[#allocation6 + $0xc4] ss:$16 sps:$4 sm:$0xff]   ;;  %v696_v21 = vld [vmem:[#allocation6 + $0xc0] ss:$16 sps:$4 sm:$0xff]   ;;  %v712_v22 = vld [vmem:[#allocation6 + $0x68] ss:$16 sps:$4 sm:$0xff]  }
  0x3f   :  { %267 = vmatprep.subr.bf16.mxu0 %v682_v5  ;;  %310 = vmatprep.subr.bf16.mxu1 %v707_v15  ;;  %v699_v23 = vld [vmem:[#allocation6 + $0xe4] ss:$16 sps:$4 sm:$0xff]   ;;  %v713_v24 = vld [vmem:[#allocation6 + $0x8c] ss:$16 sps:$4 sm:$0xff]   ;;  %v715_v25 = vld [vmem:[#allocation6 + $0x88] ss:$16 sps:$4 sm:$0xff]  }
  0x40   :  { %v716_v26 = vld [vmem:[#allocation6 + $0xac] ss:$16 sps:$4 sm:$0xff]   ;;  %v702_v27 = vld [vmem:[#allocation6 + $0xe0] ss:$16 sps:$4 sm:$0xff]   ;;  %v718_v28 = vld [vmem:[#allocation6 + $0xa8] ss:$16 sps:$4 sm:$0xff]  }
  0x41   :  { %v719_v30 = vld [vmem:[#allocation6 + $0xcc] ss:$16 sps:$4 sm:$0xff]   ;;  %v721_v31 = vld [vmem:[#allocation6 + $0xc8] ss:$16 sps:$4 sm:$0xff]   ;;  %v725_v34 = vld [vmem:[#allocation8 + $0x40] sm:$0xff]   ;;  %s859_s2 = smov [#allocation9]  }
  0x42   :  { %268 = vmatpush1.bf16.msra.mxu0 %v684_v6  ;;  %311 = vmatpush1.bf16.msra.mxu1 %v709_v17  ;;  %v722_v32 = vld [vmem:[#allocation6 + $0xec] ss:$16 sps:$4 sm:$0xff]   ;;  %v724_v33 = vld [vmem:[#allocation6 + $0xe8] ss:$16 sps:$4 sm:$0xff]   ;;  %v726_v35 = vld [vmem:[#allocation8] sm:$0xff]   ;;  %s574_s23 = sshll.u32 %s859_s2, 4  ;;  %s575_s23 = int_to_ptr.vmem [resolvable:$true] %s574_s23 }
  0x43   :  { %269 = vmatprep.subr.bf16.mxu0 %v685_v7  ;;  %312 = vmatprep.subr.bf16.mxu1 %v710_v18  ;;  %v727_v36 = vld [vmem:[#allocation8 + $0x48] sm:$0xff]   ;;  %v729_v38 = vld [vmem:[#allocation8 + $0x50] sm:$0xff]   ;;  %v731_v40 = vld [vmem:[#allocation8 + $0x58] sm:$0xff]   ;;  %s823_s24 = scalar_lea.vmem %s575_s23, 128  ;;  %p828_p11 = scmp.lt.s32.totalorder %s575_s23, %s575_s23 }
  0x44   :  { %v728_v37 = vld [vmem:[#allocation8 + $0x8] sm:$0xff]   ;;  %v730_v39 = vld [vmem:[#allocation8 + $0x10] sm:$0xff]   ;;  %v732_v41 = vld [vmem:[#allocation8 + $0x18] sm:$0xff]   ;;  %p824_p10 = scmp.ne.s32.totalorder %s575_s23, %s823_s24  ;;  %p829_p12 = scmp.lt.s32.totalorder %s823_s24, %s823_s24 }
  0x45   :  { %v733_v42 = vld [vmem:[#allocation8 + $0x60] sm:$0xff]   ;;  %v735_v44 = vld [vmem:[#allocation8 + $0x68] sm:$0xff]   ;;  %v737_v46 = vld [vmem:[#allocation8 + $0x70] sm:$0xff]  }
  0x46   :  { %270 = vmatpush1.bf16.msra.mxu0 %v687_v9  ;;  %313 = vmatpush1.bf16.msra.mxu1 %v712_v22  ;;  %v734_v43 = vld [vmem:[#allocation8 + $0x20] sm:$0xff]   ;;  %v736_v45 = vld [vmem:[#allocation8 + $0x28] sm:$0xff]   ;;  %v738_v47 = vld [vmem:[#allocation8 + $0x30] sm:$0xff]   ;;  %p830_p13 = por %p829_p12, %p828_p11 }
  0x47   :  { %271 = vmatprep.subr.bf16.mxu0 %v688_v10  ;;  %314 = vmatprep.subr.bf16.mxu1 %v713_v24  ;;  %v739_v48 = vld [vmem:[#allocation8 + $0x78] sm:$0xff]  }
  0x48   :  { %v740_v49 = vld [vmem:[#allocation8 + $0x38] sm:$0xff]   ;;  %p831_p0 = pnand %p830_p13, %p824_p10 }
  0x4a   :  { %272 = vmatpush1.bf16.msra.mxu0 %v690_v14  ;;  %315 = vmatpush1.bf16.msra.mxu1 %v715_v25 }
  0x4b   :  { %273 = vmatprep.subr.bf16.mxu0 %v691_v16  ;;  %316 = vmatprep.subr.bf16.mxu1 %v716_v26 }
  0x4e   :  { %274 = vmatpush1.bf16.msra.mxu0 %v693_v19  ;;  %317 = vmatpush1.bf16.msra.mxu1 %v718_v28 }
  0x4f   :  { %275 = vmatprep.subr.bf16.mxu0 %v694_v20  ;;  %318 = vmatprep.subr.bf16.mxu1 %v719_v30 }
  0x52   :  { %276 = vmatpush1.bf16.msra.mxu0 %v696_v21  ;;  %319 = vmatpush1.bf16.msra.mxu1 %v721_v31 }
  0x53   :  { %277 = vmatprep.subr.bf16.mxu0 %v699_v23  ;;  %320 = vmatprep.subr.bf16.mxu1 %v722_v32 }
  0x56   :  { %278 = vmatpush1.bf16.msra.mxu0 %v702_v27  ;;  %321 = vmatpush1.bf16.msra.mxu1 %v724_v33 }
  0x57   :  { %645 = vmatprep.subr.bf16.mxu0 %v725_v34 }
  0x59   :  { %296 = vmatmul.mubr.bf16.vlgmr.msra.gmra.mrb[0].mxu0 %v705_v29  ;;  %339 = vmatmul.mubr.bf16.vlgmr.msra.gmra.mrb[0].mxu1 %v705_v29 }
  0x5a   :  { %646 = vmatpush3.bf16.msra.mxu0 %v726_v35 }
  0x5b   :  { %647 = vmatprep.subr.bf16.mxu0 %v727_v36 }
  0x5e   :  { %648 = vmatpush3.bf16.msra.mxu0 %v728_v37 }
  0x5f   :  { %649 = vmatprep.subr.bf16.mxu0 %v729_v38 }
  0x62   :  { %650 = vmatpush3.bf16.msra.mxu0 %v730_v39 }
  0x63   :  { %651 = vmatprep.subr.bf16.mxu0 %v731_v40 }
  0x66   :  { %652 = vmatpush3.bf16.msra.mxu0 %v732_v41 }
  0x67   :  { %653 = vmatprep.subr.bf16.mxu0 %v733_v42 }
  0x6a   :  { %654 = vmatpush3.bf16.msra.mxu0 %v734_v43 }
  0x6b   :  { %655 = vmatprep.subr.bf16.mxu0 %v735_v44 }
  0x6e   :  { %656 = vmatpush3.bf16.msra.mxu0 %v736_v45 }
  0x6f   :  { %657 = vmatprep.subr.bf16.mxu0 %v737_v46 }
  0x72   :  { %658 = vmatpush3.bf16.msra.mxu0 %v738_v47 }
  0x73   :  { %659 = vmatprep.subr.bf16.mxu0 %v739_v48 }
  0x76   :  { %660 = vmatpush3.bf16.msra.mxu0 %v740_v49 }
 0x12c   :  { %v297_v50 = vpop.f32.mrb[0].mxu0  ;;  %v340_v62 = vpop.f32.mrb[0].mxu1 }
 0x12d   :  { %v351_v51 = vsub.f32 0.0, %v297_v50  ;;  %v299_v52 = vpop.f32.mrb[1].mxu0  ;;  %v342_v63 = vpop.f32.mrb[1].mxu1 }
 0x12e   :  { %v352_v53 = vsub.f32 0.0, %v299_v52  ;;  %v301_v54 = vpop.f32.mrb[2].mxu0  ;;  %v344_v0 = vpop.f32.mrb[2].mxu1 }
 0x12f   :  { %v355_v55 = vmul.f32 1.442695, %v351_v51  ;;  %v353_v56 = vsub.f32 0.0, %v301_v54  ;;  %v303_v57 = vpop.f32.mrb[3].mxu0  ;;  %v349_v1 = vpack.c.bf16 %v344_v0, %v340_v62  ;;  %v346_v2 = vpop.f32.mrb[3].mxu1 }
 0x130   :  { %v357_v58 = vmul.f32 1.442695, %v352_v53  ;;  %v354_v59 = vsub.f32 0.0, %v303_v57  ;;  %v350_v3 = vpack.c.bf16 %v346_v2, %v342_v63 }
 0x131   :  { %741 = vpow2.f32 %v355_v55  ;;  %v359_v60 = vmul.f32 1.442695, %v353_v56 }
 0x132   :  { %743 = vpow2.f32 %v357_v58  ;;  %v361_v61 = vmul.f32 1.442695, %v354_v59 }
 0x133   :  { %745 = vpow2.f32 %v359_v60 }
 0x134   :  { %747 = vpow2.f32 %v361_v61 }
 0x13b   :  { %v742_v4 = vpop.eup %741 }
 0x13c   :  { %v744_v5 = vpop.eup %743  ;;  %v363_v6 = vadd.f32 1.0, %v742_v4 }
 0x13d   :  { %v746_v7 = vpop.eup %745  ;;  %v364_v8 = vadd.f32 1.0, %v744_v5 }
 0x13e   :  { %v748_v9 = vpop.eup %747  ;;  %749 = vrcp.f32 %v363_v6  ;;  %v365_v10 = vadd.f32 1.0, %v746_v7 }
 0x13f   :  { %751 = vrcp.f32 %v364_v8  ;;  %v366_v11 = vadd.f32 1.0, %v748_v9 }
 0x140   :  { %753 = vrcp.f32 %v365_v10 }
 0x141   :  { %755 = vrcp.f32 %v366_v11 }
 0x148   :  { %v750_v12 = vpop.eup %749 }
 0x149   :  { %v752_v13 = vpop.eup %751  ;;  %v371_v16 = vmul.f32 %v750_v12, %v297_v50 }
 0x14a   :  { %v754_v14 = vpop.eup %753  ;;  %v372_v18 = vmul.f32 %v752_v13, %v299_v52 }
 0x14b   :  { %v756_v15 = vpop.eup %755  ;;  %v373_v17 = vmul.f32 %v754_v14, %v301_v54 }
 0x14c   :  { %v374_v19 = vmul.f32 %v756_v15, %v303_v57 }
 0x14d   :  { %v375_v20 = vpack.c.bf16 %v373_v17, %v371_v16 }
 0x14e   :  { %v376_v21 = vpack.c.bf16 %v374_v19, %v372_v18 }
 0x14f   :  { %v377_v22 = vmul.bf16 %v375_v20, %v349_v1 }
 0x150   :  { %v378_v23 = vmul.bf16 %v376_v21, %v350_v3 }
 0x152   :  { %541 = vmatprep.mubr.bf16.mxu0 %v378_v23 }
 0x153   :  { %542 = vmatmul.mubr.bf16.vlgmr.msra.gmra.mrb[4].mxu0 %v377_v22 }
 0x226   :  { %v661_v24 = vpop.f32.mrb[4].mxu0 }
 0x227   :  { %v662_v25 = vpop.f32.mrb[5].mxu0 }
 0x228   :  { %v663_v26 = vadd.f32 %v662_v25, %v661_v24  ;;  %v664_v27 = vpop.f32.mrb[6].mxu0 }
 0x229   :  { %v665_v28 = vpop.f32.mrb[7].mxu0 }
 0x22a   :  { %v666_v29 = vadd.f32 %v665_v28, %v664_v27 }
 0x22c   :  { %v643_v30 = vpack.c.bf16 %v666_v29, %v663_v26 }
 0x22e   :  { %644 = vst [vmem:[#allocation9] sm:$0xff] %v643_v30  }
 0x22f   :  { %834 = shalt.err (!%p831_p0)
}
 0x230   :  { %s835_s27 = scalar_lea.hbm %s940_s3, 128 }
 0x231   :  { %p836_p1 = scmp.ne.s32.totalorder %s940_s3, %s835_s27  ;;  %p839_p2 = scmp.lt.u32.totalorder %s835_s27, %s940_s3 }
 0x233   :  { %p841_p3 = pnand %p839_p2, %p836_p1 }
 0x235   :  { %844 = shalt.err (!%p841_p3)
}
 0x236   :  { %580 = dma.vmem_to_hbm [thread:$0]  %s575_s23, 128, %s940_s3, [#allocation5], %s855_s1, %s855_s1, %s856_s9  }
 0x237   :  { %849 = dma.done.wait [#allocation5], 128  }
 0x238   :  { %850 = vsyncadd [#allocation5], 4294967168 }
 0x239   :  { %584 = vsyncpa [#allocation4], 1 }
 0x23a   :  { %585 = vsyncpa [#allocation7], 1 }
 0x23b   :  { %586 = vsyncpa [#allocation5], 1 }

</bundles_post_ra>
